<compile_context>
chip_gen: v5e
topology: v5e:2x2
jax: 0.10.0
libtpu: 0.0.40
codegen_flags: <defaults>
</compile_context>

<pallas_src>
import random

import numpy as np

import jax
import jax.numpy as jnp
from jax.experimental import pallas as pl
from jax.experimental.pallas import tpu as pltpu


_TILE_N = 256          # output-time tile width (lane-dense; clamped to W if W < 256)
_A = -0.75             # PyTorch bicubic convolution coefficient


# ----------------------------------------------------------------------------
# Host-side (numpy) bicubic weight matrices with crop + paste folded in.
# Matches PyTorch F.interpolate(mode='bicubic', align_corners=True) including
# boundary clamping on the *cropped* tensor.
# ----------------------------------------------------------------------------
def _cubic1(t):
    # |t| <= 1 branch: (A+2)|t|^3 - (A+3)|t|^2 + 1
    return ((_A + 2.0) * t - (_A + 3.0)) * t * t + 1.0


def _cubic2(t):
    # 1 < |t| < 2 branch: A|t|^3 - 5A|t|^2 + 8A|t| - 4A
    return ((_A * t - 5.0 * _A) * t + 8.0 * _A) * t - 4.0 * _A


def crop_resize_weight_matrix(out_size, crop_size, crop_offset, paste_offset, in_size):
    """(out_size, in_size) f32 matrix M s.t.  M @ x  equals the bicubic
    (align_corners=True) resize (to out_size) of the length-`crop_size` crop taken
    at `crop_offset` of a zero canvas onto which x (length in_size) was pasted at
    `paste_offset`."""
    scale = (crop_size - 1) / (out_size - 1) if out_size > 1 else 0.0
    xs = np.arange(out_size, dtype=np.float64) * scale
    i0 = np.floor(xs)
    t = xs - i0
    i0 = i0.astype(np.int64)
    wts = np.stack(
        [_cubic2(t + 1.0), _cubic1(t), _cubic1(1.0 - t), _cubic2(2.0 - t)], axis=1
    )  # (out, 4)
    # tap indices clamped to the CROP bounds first (crop coordinates) ...
    taps = np.clip(i0[:, None] + np.arange(-1, 3)[None, :], 0, crop_size - 1)
    # ... then mapped to input coordinates; taps landing on canvas padding -> weight 0
    src = taps + crop_offset - paste_offset
    valid = (src >= 0) & (src < in_size)
    mat = np.zeros((out_size, in_size), dtype=np.float64)
    rows = np.repeat(np.arange(out_size), 4)
    np.add.at(
        mat,
        (rows, np.where(valid, src, 0).reshape(-1)),
        np.where(valid, wts, 0.0).reshape(-1),
    )
    return mat.astype(np.float32)


# ----------------------------------------------------------------------------
# Pallas kernel: for one sample / one time tile,
#   out = blockdiag(Wy_eff) @ (x @ Wx_eff^T)   as two bf16 MXU matmuls (fp32 acc)
# ----------------------------------------------------------------------------
def _rrc_kernel(x_ref, wyb_ref, wxt_ref, out_ref):
    # x_ref:   (C*H, W)    f32  -- one sample, channels collapsed into rows
    # wyb_ref: (C*H, C*H)  bf16 -- block-diagonal freq-axis weights (this sample)
    # wxt_ref: (W, TN)     bf16 -- time-axis weights^T (this sample / output tile)
    # out_ref: (C*H, TN)   f32
    x_b = x_ref[...].astype(jnp.bfloat16)                 # in-kernel cast (hides under MXU)
    # time-axis pass, all channels at once:
    tmp = jnp.dot(x_b, wxt_ref[...], preferred_element_type=jnp.float32)
    # freq-axis pass, fused over channels via block-diagonal weights:
    out_ref[...] = jnp.dot(
        wyb_ref[...], tmp.astype(jnp.bfloat16), preferred_element_type=jnp.float32
    )


@jax.jit
def _rrc_apply(x, wyb, wxt):
    """x: (B,C,H,W) f32; wyb: (B,C*H,C*H) bf16; wxt: (B,W,W) bf16 -> (B,C,H,W) f32."""
    B, C, H, W = x.shape
    CH = C * H
    tn = W if W <= _TILE_N else _TILE_N
    nt = (W + tn - 1) // tn

    x2 = x.reshape(B, CH, W)          # free row-major reshape (no data movement)

    grid_spec = pltpu.PrefetchScalarGridSpec(
        num_scalar_prefetch=0,
        grid=(B, nt),
        in_specs=[
            pl.BlockSpec((None, CH, W), lambda b, t: (b, 0, 0)),
            pl.BlockSpec((None, CH, CH), lambda b, t: (b, 0, 0)),
            pl.BlockSpec((None, W, tn), lambda b, t: (b, 0, t)),
        ],
        out_specs=pl.BlockSpec((None, CH, tn), lambda b, t: (b, 0, t)),
    )
    flops = 2 * B * (CH * W * W + CH * CH * W)
    bytes_accessed = B * (4 * CH * W + 2 * CH * CH + 2 * W * W + 4 * CH * W)

    out = pl.pallas_call(
        _rrc_kernel,
        out_shape=jax.ShapeDtypeStruct((B, CH, W), jnp.float32),
        grid_spec=grid_spec,
        compiler_params=pltpu.CompilerParams(
            dimension_semantics=("parallel", "parallel")
        ),
        cost_estimate=pl.CostEstimate(
            flops=flops, transcendentals=0, bytes_accessed=bytes_accessed
        ),
    )(x2, wyb, wxt)
    return out.reshape(B, C, H, W)    # free reshape back to (B, C, H, W)


# ----------------------------------------------------------------------------
# RandomResizeCrop — same forward semantics as the PyTorch module.
# Accepts a single (C, H, W) spectrogram (original API) or a batch (B, C, H, W);
# each batch element gets an independent random crop.
# ----------------------------------------------------------------------------
class RandomResizeCrop:
    def __init__(self, virtual_crop_scale=(1.0, 1.5), freq_scale=(0.6, 1.5),
                 time_scale=(0.6, 1.5)):
        self.virtual_crop_scale = virtual_crop_scale
        self.freq_scale = freq_scale
        self.time_scale = time_scale
        assert time_scale[1] >= 1.0 and freq_scale[1] >= 1.0
        self.last_params = None

    @staticmethod
    def get_params(virtual_crop_size, in_size, time_scale, freq_scale):
        canvas_h, canvas_w = virtual_crop_size
        src_h, src_w = in_size
        h = np.clip(int(np.random.uniform(*freq_scale) * src_h), 1, canvas_h)
        w = np.clip(int(np.random.uniform(*time_scale) * src_w), 1, canvas_w)
        i = random.randint(0, canvas_h - h) if canvas_h > h else 0
        j = random.randint(0, canvas_w - w) if canvas_w > w else 0
        return (i, j, h, w)

    def __call__(self, lms):
        squeeze = (lms.ndim == 3)
        x = lms[None] if squeeze else lms
        B, C, H, W = x.shape
        Hc = int(H * self.virtual_crop_scale[0])
        Wc = int(W * self.virtual_crop_scale[1])
        y0, x0 = (Hc - H) // 2, (Wc - W) // 2        # centered paste offsets

        # Fold canvas paste + random crop + bicubic resize into fixed-shape weight
        # matrices per sample (bf16 on host -> halves H2D bytes).
        eye_c = np.eye(C, dtype=np.float32)
        wyb = np.empty((B, C * H, C * H), np.float32)
        wxt = np.empty((B, W, W), np.float32)
        params = []
        for b in range(B):
            i, j, h, w = self.get_params(
                (Hc, Wc), (H, W), self.time_scale, self.freq_scale)
            params.append((i, j, h, w))
            wy = crop_resize_weight_matrix(H, h, i, y0, H)   # (H, H)
            wx = crop_resize_weight_matrix(W, w, j, x0, W)   # (W, W)
            wyb[b] = np.kron(eye_c, wy)                      # block-diag over channels
            wxt[b] = wx.T
        self.last_params = params[0] if squeeze else params

        out = _rrc_apply(
            jnp.asarray(x, dtype=jnp.float32),
            jnp.asarray(wyb.astype(jnp.bfloat16)),
            jnp.asarray(wxt.astype(jnp.bfloat16)),
        )
        return out[0] if squeeze else out


if __name__ == "__main__":
    np.random.seed(0)
    random.seed(0)
    key = jax.random.PRNGKey(0)

    B, C, H, W = 2, 4, 16, 16
    lms = jax.random.normal(key, (B, C, H, W), dtype=jnp.float32)

    rrc = RandomResizeCrop()
    out = jax.block_until_ready(rrc(lms))
    assert out.shape == (B, C, H, W) and out.dtype == jnp.float32

    # Reference: follow the original module structure explicitly per sample
    # (zero canvas -> centered paste -> crop -> bicubic resize), in fp32 numpy.
    lms_np = np.asarray(lms)
    Hc = int(H * rrc.virtual_crop_scale[0])
    Wc = int(W * rrc.virtual_crop_scale[1])
    y0, x0 = (Hc - H) // 2, (Wc - W) // 2
    for b in range(B):
        i, j, h, w = rrc.last_params[b]
        canvas = np.zeros((C, Hc, Wc), np.float32)
        canvas[:, y0:y0 + H, x0:x0 + W] = lms_np[b]
        crop = canvas[:, i:i + h, j:j + w]
        wy_plain = crop_resize_weight_matrix(H, h, 0, 0, h)   # plain bicubic (H, h)
        wx_plain = crop_resize_weight_matrix(W, w, 0, 0, w)   # plain bicubic (W, w)
        ref = np.einsum("oh,chw,tw->cot", wy_plain, crop, wx_plain)
        # bf16 MXU operands (fp32 accumulation) -> ~1e-2 absolute error vs fp32 ref
        np.testing.assert_allclose(np.asarray(out[b]), ref, rtol=1e-1, atol=1e-1)

    # Single-sample call matches the original module API (C, H, W) -> (C, H, W).
    out1 = jax.block_until_ready(rrc(lms[0]))
    assert out1.shape == (C, H, W)

    # Second batched call with different random crops reuses the compiled kernel
    # (all operand shapes are static -> no Mosaic recompile).
    out2 = jax.block_until_ready(rrc(lms))
    assert out2.shape == (B, C, H, W)

    print("KERNEL_OK")
</pallas_src>

<mosaic_0001>
module attributes {stable_mosaic.version = 11 : i64} {
  func.func @_rrc_kernel(%arg0: i32, %arg1: i32, %arg2: memref<1x64x16xf32, #tpu.memory_space<vmem>>, %arg3: memref<1x64x64xbf16, #tpu.memory_space<vmem>>, %arg4: memref<1x16x16xbf16, #tpu.memory_space<vmem>>, %arg5: memref<1x64x16xf32, #tpu.memory_space<vmem>>) attributes {dimension_semantics = [#tpu.dimension_semantics<parallel>, #tpu.dimension_semantics<parallel>], iteration_bounds = array<i64: 2, 1>, scalar_prefetch = 0 : i64, scratch_operands = 0 : i64, tpu.core_type = #tpu.core_type<tc>, window_params = [{transform_indices = @transform_0, window_bounds = array<i64: 1, 64, 16>}, {transform_indices = @transform_1, window_bounds = array<i64: 1, 64, 64>}, {transform_indices = @transform_2, window_bounds = array<i64: 1, 16, 16>}, {transform_indices = @transform_3, window_bounds = array<i64: 1, 64, 16>}]} {
    %c0 = arith.constant 0 : index
    %c0_0 = arith.constant 0 : index
    %c0_1 = arith.constant 0 : index
    %0 = vector.load %arg2[%c0, %c0_0, %c0_1] : memref<1x64x16xf32, #tpu.memory_space<vmem>>, vector<1x64x16xf32>
    %1 = vector.shape_cast %0 : vector<1x64x16xf32> to vector<64x16xf32>
    %2 = arith.truncf %1 : vector<64x16xf32> to vector<64x16xbf16>
    %c0_2 = arith.constant 0 : index
    %c0_3 = arith.constant 0 : index
    %c0_4 = arith.constant 0 : index
    %3 = vector.load %arg4[%c0_2, %c0_3, %c0_4] : memref<1x16x16xbf16, #tpu.memory_space<vmem>>, vector<1x16x16xbf16>
    %4 = vector.shape_cast %3 : vector<1x16x16xbf16> to vector<16x16xbf16>
    %cst = arith.constant dense<0.000000e+00> : vector<64x16xf32>
    %5 = tpu.matmul %2, %4, %cst {dimension_numbers = #tpu.dot_dimension_numbers<[1], [0], [0], [1], [0, 0, 1, 1], [], []>} : vector<64x16xbf16>, vector<16x16xbf16>, vector<64x16xf32> -> vector<64x16xf32>
    %c0_5 = arith.constant 0 : index
    %c0_6 = arith.constant 0 : index
    %c0_7 = arith.constant 0 : index
    %6 = vector.load %arg3[%c0_5, %c0_6, %c0_7] : memref<1x64x64xbf16, #tpu.memory_space<vmem>>, vector<1x64x64xbf16>
    %7 = vector.shape_cast %6 : vector<1x64x64xbf16> to vector<64x64xbf16>
    %8 = arith.truncf %5 : vector<64x16xf32> to vector<64x16xbf16>
    %cst_8 = arith.constant dense<0.000000e+00> : vector<64x16xf32>
    %9 = tpu.matmul %7, %8, %cst_8 {dimension_numbers = #tpu.dot_dimension_numbers<[1], [0], [0], [1], [0, 0, 1, 1], [], []>} : vector<64x64xbf16>, vector<64x16xbf16>, vector<64x16xf32> -> vector<64x16xf32>
    %c0_9 = arith.constant 0 : index
    %c0_10 = arith.constant 0 : index
    %c0_11 = arith.constant 0 : index
    %10 = vector.load %arg5[%c0_9, %c0_10, %c0_11] : memref<1x64x16xf32, #tpu.memory_space<vmem>>, vector<1x64x16xf32>
    %11 = vector.shape_cast %10 : vector<1x64x16xf32> to vector<64x16xf32>
    %12 = vector.shape_cast %9 : vector<64x16xf32> to vector<1x64x16xf32>
    tpu.vector_store %arg5[%c0_9, %c0_10, %c0_11], %12 {strides = array<i32>} : memref<1x64x16xf32, #tpu.memory_space<vmem>>, vector<1x64x16xf32>,
    return
  }
  func.func @transform_0(%arg0: i32, %arg1: i32) -> (i32, i32, i32) {
    %c0_i32 = arith.constant 0 : i32
    %c0_i32_0 = arith.constant 0 : i32
    %c0_i32_1 = arith.constant 0 : i32
    return %arg0, %c0_i32, %c0_i32_0 : i32, i32, i32
  }
  func.func @transform_1(%arg0: i32, %arg1: i32) -> (i32, i32, i32) {
    %c0_i32 = arith.constant 0 : i32
    %c0_i32_0 = arith.constant 0 : i32
    %c0_i32_1 = arith.constant 0 : i32
    return %arg0, %c0_i32, %c0_i32_0 : i32, i32, i32
  }
  func.func @transform_2(%arg0: i32, %arg1: i32) -> (i32, i32, i32) {
    %c0_i32 = arith.constant 0 : i32
    %c0_i32_0 = arith.constant 0 : i32
    return %arg0, %c0_i32, %arg1 : i32, i32, i32
  }
  func.func @transform_3(%arg0: i32, %arg1: i32) -> (i32, i32, i32) {
    %c0_i32 = arith.constant 0 : i32
    %c0_i32_0 = arith.constant 0 : i32
    return %arg0, %c0_i32, %arg1 : i32, i32, i32
  }
}

</mosaic_0001>

<bundles_post_ra>
// kernel: _rrc_apply.1
= control target key start
LH: loop header
LB: loop body
LE: loop exit
PB: predicated region body
PF: predicated region fallthrough
CT: control target
= control target key end

     0   :  { %s1120_s0 = inlined_call_operand.hbm [shape: f32[2,64,16], index: 0, kind: input, shape index: {}]   ;;  %s1121_s1 = inlined_call_operand.hbm [shape: bf16[2,64,64], index: 1, kind: input, shape index: {}]   ;;  %s1122_s2 = inlined_call_operand.hbm [shape: bf16[2,16,16], index: 2, kind: input, shape index: {}]   ;;  %s1123_s3 = inlined_call_operand.hbm [shape: f32[2,64,16], index: 3, kind: output, shape index: {}]  }
   0x1   :  { %1130 = sst [smem:[#allocation16_spill]] %s1121_s1 }
   0x2   :  { %8 = vsyncpa [#allocation3], 0 }
   0x3   :  { %10 = vsyncpa [#allocation3 + $0x1], 0 }
   0x4   :  { %11 = vsyncpa [#allocation6], 0 }
   0x5   :  { %13 = vsyncpa [#allocation6 + $0x1], 0 }
   0x6   :  { %14 = vsyncpa [#allocation4], 0 }
   0x7   :  { %16 = vsyncpa [#allocation4 + $0x1], 0  ;;  %s926_s12 = smov 0   ;;  %s928_s13 = smov 0  }
   0x8   :  { %s930_s14 = smov 0   ;;  %s932_s15 = smov 0  }
   0x9   :  { %s934_s16 = smov 0   ;;  %s936_s17 = smov 0  }
   0xa LB: > { %1131 = sst [smem:[#allocation12_spill]] %s886_s14  ;;  %s957_s18 = sadd.s32 4294967295, %s898_s17   ;;  %s898_s17 = sphi %s936_s17, %s22_s17   ;;  %s894_s16 = sphi %s934_s16, %s1151_s16   ;;  %s890_s15 = sphi %s932_s15, %s1150_s15   ;;  %s886_s14 = sphi %s930_s14, %s1146_s14   ;;  %s882_s13 = sphi %s928_s13, %s1149_s13   ;;  %s878_s12 = sphi %s926_s12, %s1148_s12  }
   0xb   : > { %1132 = sst [smem:[#allocation13_spill]] %s898_s17  ;;  %s580_s19 = sadd.s32 4294967294, %s898_s17  }
   0xc   : > { %s34_s20 = sadd.s32 1, %s894_s16  ;;  %s41_s21 = sadd.s32 1, %s886_s14 }
   0xd   : > { %p36_p0 = scmp.ge.s32.totalorder %s34_s20, 2  ;;  %p48_p1 = scmp.ne.s32.totalorder %s886_s14, %s882_s13 }
   0xe   : > { %p49_p2 = scmp.eq.s32.totalorder %s898_s17, 0  ;;  %p54_p3 = scmp.ne.s32.totalorder %s882_s13, %s878_s12 }
   0xf   : > { %s1153_s20 = smov (%p36_p0, %s34_s20), 0  ;;  %p55_p5 = scmp.eq.s32.totalorder %s957_s18, 0 }
  0x10   : > { %1133 = sst [smem:[#allocation14_spill]] %s1153_s20  ;;  %p969_p4 = por %p49_p2, %p48_p1 }
  0x11   : > { %s38_s23 = ssub.s32 %s894_s16, %s1153_s20  ;;  %p134_p6 = scmp.eq.s32.totalorder %s957_s18, 1 }
  0x12   : > { %p39_p7 = scmp.eq.s32.totalorder %s38_s23, 0  ;;  %p977_p8 = por %p55_p5, %p54_p3 }
  0x13   : > { %p981_p9 = por %p134_p6, %p48_p1  ;;  %p140_p10 = scmp.eq.s32.totalorder %s580_s19, 1 }
  0x14   : > { %s986_s26 = scalar_select %p39_p7, %s886_s14, %s41_s21  }
  0x15   : > { %p988_p11 = por %p140_p10, %p54_p3  ;;  %p582_p12 = scmp.ge.s32.totalorder %s898_s17, 2 }
  0x16   : > { %1137 = sst [smem:[#allocation15_spill]] %s986_s26  ;;  %p666_p13 = scmp.lt.s32.totalorder %s898_s17, 2 }
  0x17   : > { %s995_s28 = sand.u32 1, %s886_s14   ;;  %s182_s29 = sand.u32 1, %s898_s17  }
  0x18   : > { %s586_s30 = sshll.u32 %s995_s28, 5  ;;  %p1001_p0 = pnand %p666_p13, %p969_p4 }
  0x19   : > { %s631_s5 = sshll.u32 %s894_s16, 5  ;;  %s1140_s1 = sld [smem:[#allocation16_spill]] }
  0x1a   : > { %s186_s10 = scalar_lea.vmem [#allocation5], %s586_s30  ;;  %s1009_s19 = scalar_lea.sflag [#allocation6], %s182_s29 }
  0x1b   : > { %s194_s11 = sshll.u32 %s186_s10, 4  ;;  %s1124_s21 = smov 64   ;;  %s195_s11 = int_to_ptr.vmem [resolvable:$true] %s194_s11 }
  0x1c   : > { %s1125_s22 = smov 4   ;;  %p592_p1 = scmp.ge.s32.totalorder %s898_s17, 1 }
  0x1d   : > { %p225_p2 = scmp.lt.s32.totalorder %s898_s17, 3  ;;  %s583_s30 = sshll.u32 %s995_s28, 6 }
  0x1e   : > { %s630_s29 = sshll.u32 %s894_s16, 6  ;;  %s164_s10 = scalar_lea.vmem [#allocation2], %s583_s30 }
  0x1f   : > { %s191_s8 = scalar_lea.hbm %s1140_s1, %s631_s5  ;;  %p1019_p3 = pnand %p592_p1, %p225_p2 }
  0x20   : > { %s192_s9 = sshll.u32 %s191_s8, 4  ;;  %s169_s7 = scalar_lea.hbm %s1120_s0, %s630_s29  ;;  %s193_s9 = int_to_ptr.hbm [resolvable:$true] %s192_s9 }
  0x21   : > { %658 = dma.hbm_to_vmem [thread:$0]  (!%p1001_p0), %s193_s9, 512, %s195_s11, %s1009_s19, %s1124_s21, %s1124_s21, %s1125_s22  }
  0x22   : > { %s170_s8 = sshll.u32 %s169_s7, 4  ;;  %s172_s1 = sshll.u32 %s164_s10, 4  ;;  %s171_s8 = int_to_ptr.hbm [resolvable:$true] %s170_s8  ;;  %s173_s1 = int_to_ptr.vmem [resolvable:$true] %s172_s1 }
  0x23   : > { %s161_s9 = scalar_lea.sflag [#allocation3], %s995_s28  ;;  %s902_s11 = smov 128  }
  0x24   : > { %s903_s21 = smov 8   ;;  %s589_s22 = sshll.u32 %s995_s28, 3 }
  0x25   : > { %655 = dma.hbm_to_vmem [thread:$0]  (!%p1001_p0), %s171_s8, 1024, %s173_s1, %s161_s9, %s902_s11, %s902_s11, %s903_s21  }
  0x26   : > { %s632_s20 = sshll.u32 %s894_s16, 3  ;;  %s208_s29 = scalar_lea.vmem [#allocation7], %s589_s22 }
  0x27   : > { %s214_s17 = scalar_lea.hbm %s1122_s2, %s632_s20  ;;  %s217_s6 = sshll.u32 %s208_s29, 4  ;;  %s218_s6 = int_to_ptr.vmem [resolvable:$true] %s217_s6 }
  0x28   : > { %s215_s5 = sshll.u32 %s214_s17, 4  ;;  %s1142_s30 = smov 4   ;;  %s216_s5 = int_to_ptr.hbm [resolvable:$true] %s215_s5 }
  0x29   : > { %s1143_s7 = smov 64   ;;  %229 = sbr.rel (%p1019_p3) target bundleno = 405 (0x195), region = 32 }
  0x2a   : > { %661 = dma.hbm_to_vmem [thread:$0]  (!%p1001_p0), %s216_s5, 128, %s218_s6, %s1009_s19, %s1143_s7, %s1143_s7, %s1142_s30  }
  0x2b   : > { %s1045_s1 = sand.u32 (!%p1019_p3), 1, %s882_s13  }
  0x2c   : > { %s593_s14 = sshll.u32 (!%p1019_p3), %s1045_s1, 6  ;;  %s232_s17 = scalar_lea.sflag (!%p1019_p3), [#allocation3], %s1045_s1 }
  0x2d   : > { %s235_s20 = scalar_lea.vmem (!%p1019_p3), [#allocation2], %s593_s14 }
  0x2e   : > { %865 = dma.done.wait (%p977_p8), %s232_s17, 1024  }
  0x2f   : > { %867 = vsyncadd (%p977_p8), %s232_s17, 4294966272  ;;  %s241_s26 = sand.u32 1, %s957_s18   ;;  %s594_s28 = sshll.u32 %s1045_s1, 5 }
  0x30   : > { %s242_s4 = scalar_lea.sflag [#allocation6], %s241_s26  ;;  %s1057_s19 = scalar_lea.vmem [#allocation5], %s594_s28 }
  0x31   : > { %869 = dma.done.wait (%p977_p8), %s242_s4, 640  }
  0x32   : > { %871 = vsyncadd (%p977_p8), %s242_s4, 4294966656  ;;  %s595_s21 = sshll.u32 %s1045_s1, 3  ;;  %v292_v1 = vld [vmem:[%s235_s20 + $0x10] sm:$0xff]  ;;  %v293_v2 = vld [vmem:[%s235_s20 + $0x18] sm:$0xff]  ;;  %vm310_vm0 = vcmask 130048   ;;  %vm384_vm1 = vcmask 523264  }
  0x33   : > { %s255_s22 = scalar_lea.vmem [#allocation7], %s595_s21  ;;  %v299_v3 = vpack.c.bf16 %v293_v2, %v292_v1  ;;  %v290_v4 = vld [vmem:[%s235_s20] sm:$0xff]  ;;  %v291_v5 = vld [vmem:[%s235_s20 + $0x8] sm:$0xff]  ;;  %v296_v10 = vld [vmem:[%s235_s20 + $0x30] sm:$0xff]  ;;  %s288_s18 = scalar_lea.vmem [#allocation8], %s593_s14 }
  0x34   : > { %v633_v0 = vld [vmem:[%s255_s22] sm:$0xff]  ;;  %v298_v6 = vpack.c.bf16 %v291_v5, %v290_v4  ;;  %v297_v11 = vld [vmem:[%s235_s20 + $0x38] sm:$0xff]  ;;  %v636_v26 = vld [vmem:[%s1057_s19 + $0x10] sm:$0xff]  ;;  %s638_s24 = sshll.u32 %s890_s15, 6  ;;  %s448_s9 = sshll.u32 %s288_s18, 4  ;;  %s449_s9 = int_to_ptr.vmem [resolvable:$true] %s448_s9 }
  0x35   : > { %639 = vmatpush.bf16.msra.mxu3 %v633_v0  ;;  %330 = vmatpush.bf16.msra.mxu0 %v633_v0  ;;  %v294_v7 = vld [vmem:[%s235_s20 + $0x20] sm:$0xff]  ;;  %v295_v8 = vld [vmem:[%s235_s20 + $0x28] sm:$0xff]  ;;  %v301_v12 = vpack.c.bf16 %v297_v11, %v296_v10  ;;  %v637_v28 = vld [vmem:[%s1057_s19 + $0x18] sm:$0xff]  ;;  %s447_s10 = scalar_lea.hbm %s1123_s3, %s638_s24  ;;  %s435_s5 = scalar_lea.sflag [#allocation4], %s1045_s1 }
  0x36   : > { %v300_v9 = vpack.c.bf16 %v295_v8, %v294_v7  ;;  %v634_v25 = vld [vmem:[%s1057_s19] sm:$0xff]  ;;  %v635_v27 = vld [vmem:[%s1057_s19 + $0x8] sm:$0xff]  ;;  %s450_s11 = sshll.u32 %s447_s10, 4  ;;  %s832_s7 = scalar_lea.hbm %s1123_s3, 128  ;;  %s451_s11 = int_to_ptr.hbm [resolvable:$true] %s450_s11 }
  0x37   : > { %s826_s15 = sshra.s32 %s451_s11, 4  ;;  %s827_s15 = int_to_ptr.hbm [resolvable:$true] %s826_s15 }
  0x38   : > { %602 = vmatmul.msk.bf16.vlgmr.msra.gmra.mxu3 %vm310_vm0, %v299_v3  ;;  %601 = vmatmul.msk.bf16.vlgmr.msra.gmra.mxu0 %vm310_vm0, %v298_v6  ;;  %s828_s29 = scalar_lea.hbm %s827_s15, 64  ;;  %p833_p7 = scmp.lt.s32.totalorder %s827_s15, %s1123_s3 }
  0x39   : > { %p829_p4 = scmp.ne.s32.totalorder %s827_s15, %s828_s29  ;;  %p834_p8 = scmp.lt.s32.totalorder %s832_s7, %s828_s29 }
  0x3b   : > { %p830_p5 = pnand %p829_p4, %p981_p9  ;;  %p835_p10 = por %p834_p8, %p833_p7 }
  0x3d   : > { %p831_p6 = pneg %p830_p5 }
  0x3f   : > { %p836_p13 = pnand %p835_p10, %p831_p6 }
  0x48   : > { %603 = vmatmul.msk.bf16.gmra.mxu3 %vm310_vm0, %v300_v9 }
  0x58   : > { %604 = vmatmul.msk.bf16.gmra.mxu3 %vm310_vm0, %v301_v12 }
  0xb5   : > { %v332_v18 = vpop.f32.mrf.mxu0 }
  0xbb   : > { %v337_v13 = vpop.f32.mrf.mxu3 }
  0xbd   : > { %v334_v23 = vpop.f32.mrf.mxu0 }
  0xbe   : > { %v360_v24 = vpack.c.bf16 %v334_v23, %v332_v18 }
  0xc3   : > { %v339_v14 = vpop.f32.mrf.mxu3 }
  0xc4   : > { %v361_v22 = vpack.c.bf16 %v339_v14, %v337_v13 }
  0xcb   : > { %v342_v15 = vpop.f32.mrf.mxu3 }
  0xd3   : > { %v344_v16 = vpop.f32.mrf.mxu3 }
  0xd4   : > { %v362_v21 = vpack.c.bf16 %v344_v16, %v342_v15 }
  0xdb   : > { %v347_v17 = vpop.f32.mrf.mxu3 }
  0xe3   : > { %v349_v19 = vpop.f32.mrf.mxu3 }
  0xe4   : > { %v363_v20 = vpack.c.bf16 %v349_v19, %v347_v17 }
  0xe6   : > { %401 = vmatpush.bf16.msra.mxu1 %v363_v20  ;;  %640 = vmatpush.bf16.msra.mxu2 %v363_v20 }
  0xea   : > { %402 = vmatpush.bf16.msra.mxu1 %v362_v21  ;;  %641 = vmatpush.bf16.msra.mxu2 %v362_v21 }
  0xee   : > { %403 = vmatpush.bf16.msra.mxu1 %v361_v22  ;;  %642 = vmatpush.bf16.msra.mxu2 %v361_v22 }
  0xf2   : > { %404 = vmatpush.bf16.msra.mxu1 %v360_v24  ;;  %643 = vmatpush.bf16.msra.mxu2 %v360_v24 }
  0xf5   : > { %621 = vmatmul.msk.bf16.vlgmr.msra.gmra.mxu1 %vm384_vm1, %v634_v25  ;;  %623 = vmatmul.msk.bf16.vlgmr.msra.gmra.mxu2 %vm384_vm1, %v636_v26 }
 0x105   : > { %622 = vmatmul.msk.bf16.gmra.mxu1 %vm384_vm1, %v635_v27  ;;  %624 = vmatmul.msk.bf16.gmra.mxu2 %vm384_vm1, %v637_v28 }
 0x172   : > { %v406_v29 = vpop.f32.mrf.mxu1 }
 0x173   : > { %426 = vst.msk [vmem:[%s288_s18] sm:$0xff] %vm310_vm0, %v406_v29 }
 0x178   : > { %v416_v30 = vpop.f32.mrf.mxu2 }
 0x179   : > { %430 = vst.msk [vmem:[%s288_s18 + $0x20] sm:$0xff] %vm310_vm0, %v416_v30 }
 0x17a   : > { %v408_v31 = vpop.f32.mrf.mxu1 }
 0x17b   : > { %427 = vst.msk [vmem:[%s288_s18 + $0x8] sm:$0xff] %vm310_vm0, %v408_v31 }
 0x180   : > { %v418_v32 = vpop.f32.mrf.mxu2 }
 0x181   : > { %431 = vst.msk [vmem:[%s288_s18 + $0x28] sm:$0xff] %vm310_vm0, %v418_v32 }
 0x182   : > { %v411_v33 = vpop.f32.mrf.mxu1 }
 0x183   : > { %428 = vst.msk [vmem:[%s288_s18 + $0x10] sm:$0xff] %vm310_vm0, %v411_v33 }
 0x188   : > { %v421_v34 = vpop.f32.mrf.mxu2 }
 0x189   : > { %432 = vst.msk [vmem:[%s288_s18 + $0x30] sm:$0xff] %vm310_vm0, %v421_v34 }
 0x18a   : > { %v413_v35 = vpop.f32.mrf.mxu1 }
 0x18b   : > { %429 = vst.msk [vmem:[%s288_s18 + $0x18] sm:$0xff] %vm310_vm0, %v413_v35 }
 0x190   : > { %v423_v36 = vpop.f32.mrf.mxu2 }
 0x191   : > { %433 = vst.msk [vmem:[%s288_s18 + $0x38] sm:$0xff] %vm310_vm0, %v423_v36 }
 0x192   : > { %839 = shalt.err (!%p836_p13)
}
 0x193   : > { %s904_s1 = smov 128   ;;  %s905_s20 = smov 8  }
 0x194   : > { %650 = dma.vmem_to_hbm [thread:$0]  (%p981_p9), %s449_s9, 1024, %s451_s11, %s435_s5, %s904_s1, %s904_s1, %s905_s20  }
 0x195 PF: > { %s1144_s26 = sld [smem:[#allocation13_spill]]  ;;  %s465_s28 = sand.u32 1, %s878_s12  }
 0x196   : > { %p663_p0 = pnand %p582_p12, %p988_p11  ;;  %s466_s4 = scalar_lea.sflag [#allocation4], %s465_s28 }
 0x198   : > { %p664_p1 = pneg %p663_p0 }
 0x19a   : > { %873 = dma.done.wait (%p664_p1), %s466_s4, 1024  }
 0x19b   : > { %875 = vsyncadd (%p664_p1), %s466_s4, 4294966272  ;;  %s22_s17 = sadd.s32 1, %s1144_s26   ;;  %s1145_s19 = sld [smem:[#allocation12_spill]] }
 0x19c   : > { %p19_p2 = scmp.ge.s32.totalorder %s22_s17, 4   ;;  %s1146_s14 = sld [smem:[#allocation15_spill]] }
 0x19d   : > { %s1147_s25 = sld [smem:[#allocation14_spill]]  ;;  %s1148_s12 = smov %s882_s13 }
 0x19e   : > { %s1150_s15 = smov %s894_s16 }
 0x19f   :  { %21 = sbr.rel (!%p19_p2) target bundleno = 10 (0xa), region = 101 }
 0x1a1   : > { %s1149_s13 = smov %s1145_s19 }
 0x1a3   : > { %s1151_s16 = smov %s1147_s25 }
 0x1a4   :  { %472 = vsyncpa [#allocation3], 1 }
 0x1a5   :  { %474 = vsyncpa [#allocation3 + $0x1], 1 }
 0x1a6   :  { %475 = vsyncpa [#allocation6], 1 }
 0x1a7   :  { %477 = vsyncpa [#allocation6 + $0x1], 1 }
 0x1a8   :  { %478 = vsyncpa [#allocation4], 1 }
 0x1a9   :  { %480 = vsyncpa [#allocation4 + $0x1], 1 }

</bundles_post_ra>
